<compile_context>
chip_gen: v5e
topology: v5e:2x2
jax: 0.10.0
libtpu: 0.0.40
codegen_flags: <defaults>
</compile_context>

<pallas_src>
import jax
import jax.numpy as jnp
from jax.experimental import pallas as pl
from jax.experimental.pallas import tpu as pltpu


def _round_up(x, m):
    return (x + m - 1) // m * m


def classifier_kernel(x_ref, w1_ref, b1_ref, w2_ref, b2_ref,
                      sig_ref, probs_ref, fc2_ref):
    # fc1 + ReLU: cast activations to bf16 in-kernel (avoids a wrapper-side
    # pad/cast HBM round trip); accumulate in f32.
    x = x_ref[...].astype(jnp.bfloat16)                                  # [TB, n_in]
    h = jnp.dot(x, w1_ref[...], preferred_element_type=jnp.float32)     # [TB, hid_p] f32
    h = jnp.maximum(h + b1_ref[...], 0.0)

    # fc2 (pad hidden columns of h are exactly zero and pad rows of w2 are
    # zero, so the result is exact for the real hidden units).
    fc2 = jnp.dot(h.astype(w2_ref.dtype), w2_ref[...],
                  preferred_element_type=jnp.float32) + b2_ref[...]      # [TB, n_out] f32

    # sigmoid(fc2) on the EUP, then softmax over the real class lanes
    # (outputs are un-padded, so no lane masking is needed).
    sig = jax.nn.sigmoid(fc2)
    m = jnp.max(sig, axis=1, keepdims=True)
    e = jnp.exp(sig - m)
    probs = e / jnp.sum(e, axis=1, keepdims=True)                        # exact normalization

    sig_ref[...] = sig
    probs_ref[...] = probs
    fc2_ref[...] = fc2


def prepare_params(w1, b1, w2, b2):
    """One-time padding + bf16 cast of the classifier parameters (hoisted out
    of the per-call path).  Hidden dim is padded to a multiple of 128 with
    zeros so fc2 stays exact; weights go to bf16 for the MXU, biases stay f32.
    w1: [n_in, hidden], b1: [hidden], w2: [hidden, n_out], b2: [n_out]."""
    n_in, hidden = w1.shape
    n_out = w2.shape[1]
    hid_p = _round_up(hidden, 128)                          # 200 -> 256

    w1p = jnp.zeros((n_in, hid_p), jnp.bfloat16).at[:, :hidden].set(
        w1.astype(jnp.bfloat16))
    b1p = jnp.zeros((1, hid_p), jnp.float32).at[:, :hidden].set(
        b1.astype(jnp.float32)[None, :])
    w2p = jnp.zeros((hid_p, n_out), jnp.bfloat16).at[:hidden, :].set(
        w2.astype(jnp.bfloat16))
    b2p = b2.astype(jnp.float32)[None, :]
    return w1p, b1p, w2p, b2p


def classifier_forward(x, params, *, tb_max=2048):
    """x: [B, C, H, W] (NCHW).  params = prepare_params(w1, b1, w2, b2).
    Returns (sigmoid(fc2), softmax(sigmoid(fc2)), fc2), each [B, n_out] f32."""
    w1p, b1p, w2p, b2p = params
    B = x.shape[0]
    x2d = x.reshape(B, -1).astype(jnp.float32)
    n_in = x2d.shape[1]
    hid_p = w1p.shape[1]
    n_out = w2p.shape[1]
    assert w1p.shape[0] == n_in, "flattened input size must match fc1"

    # Batch tiling: minimize padding; force >=2 grid steps when B is large
    # enough so the "parallel" axis can use both TensorCores on v7x.
    n_tiles = pl.cdiv(B, tb_max)
    if n_tiles == 1 and B >= 16:
        n_tiles = 2
    if n_tiles == 1:
        tb = B                       # single block == full batch dim (no padding)
        b_p = B
        xp = x2d
    else:
        tb = _round_up(pl.cdiv(B, n_tiles), 8)
        b_p = n_tiles * tb
        xp = x2d if b_p == B else jnp.pad(x2d, ((0, b_p - B), (0, 0)))

    cost = pl.CostEstimate(
        flops=2 * b_p * (n_in * hid_p + hid_p * n_out),
        transcendentals=2 * b_p * n_out,
        bytes_accessed=(b_p * n_in * 4                      # x (f32 read)
                        + w1p.size * 2 + w2p.size * 2       # bf16 weights
                        + b1p.size * 4 + b2p.size * 4
                        + 3 * b_p * n_out * 4),             # un-padded outputs
    )

    sig, probs, fc2 = pl.pallas_call(
        classifier_kernel,
        out_shape=tuple(jax.ShapeDtypeStruct((b_p, n_out), jnp.float32)
                        for _ in range(3)),
        grid=(n_tiles,),
        in_specs=[
            pl.BlockSpec((tb, n_in), lambda i: (i, 0)),       # x tile (pipelined)
            pl.BlockSpec((n_in, hid_p), lambda i: (0, 0)),    # w1 (resident)
            pl.BlockSpec((1, hid_p), lambda i: (0, 0)),       # b1 (resident)
            pl.BlockSpec((hid_p, n_out), lambda i: (0, 0)),   # w2 (resident)
            pl.BlockSpec((1, n_out), lambda i: (0, 0)),       # b2 (resident)
        ],
        out_specs=tuple(pl.BlockSpec((tb, n_out), lambda i: (i, 0))
                        for _ in range(3)),
        compiler_params=pltpu.CompilerParams(
            dimension_semantics=("parallel",),
            vmem_limit_bytes=32 * 1024 * 1024,
        ),
        cost_estimate=cost,
    )(xp, w1p, b1p, w2p, b2p)

    if b_p == B:
        return sig, probs, fc2
    return sig[:B], probs[:B], fc2[:B]


def init_params(key, n_inputs, n_outputs, hidden=200):
    k1, k2, k3, k4 = jax.random.split(key, 4)
    # deterministic synthetic init (roughly like PyTorch's uniform fan-in init)
    lim1 = 1.0 / jnp.sqrt(n_inputs)
    lim2 = 1.0 / jnp.sqrt(hidden)
    w1 = jax.random.uniform(k1, (n_inputs, hidden), jnp.float32, -lim1, lim1)
    b1 = jax.random.uniform(k2, (hidden,), jnp.float32, -lim1, lim1)
    w2 = jax.random.uniform(k3, (hidden, n_outputs), jnp.float32, -lim2, lim2)
    b2 = jax.random.uniform(k4, (n_outputs,), jnp.float32, -lim2, lim2)
    return w1, b1, w2, b2


if __name__ == "__main__":
    key = jax.random.PRNGKey(0)
    k_x, k_p = jax.random.split(key)

    B, C, H, W = 2, 4, 16, 16
    n_inputs = C * H * W            # 1024
    n_outputs = 10

    x = jax.random.normal(k_x, (B, C, H, W), jnp.float32)
    w1, b1, w2, b2 = init_params(k_p, n_inputs, n_outputs)

    # One-time parameter prep (padding + bf16 cast), hoisted out of the call path.
    params = prepare_params(w1, b1, w2, b2)

    sig, probs, fc2 = classifier_forward(x, params)
    jax.block_until_ready((sig, probs, fc2))

    # Reference check in plain JAX (same bf16 MXU casts as the kernel).
    # Note: bf16 inputs to the matmuls mean ~1e-2-level deltas vs an fp32
    # PyTorch reference; intentional, covered by the tolerances below.
    x2d = x.reshape(B, -1)
    h_ref = jnp.maximum(
        jnp.dot(x2d.astype(jnp.bfloat16), w1.astype(jnp.bfloat16),
                preferred_element_type=jnp.float32) + b1, 0.0)
    fc2_ref = jnp.dot(h_ref.astype(jnp.bfloat16), w2.astype(jnp.bfloat16),
                      preferred_element_type=jnp.float32) + b2
    sig_ref = jax.nn.sigmoid(fc2_ref)
    probs_ref = jax.nn.softmax(sig_ref, axis=1)

    assert sig.shape == (B, n_outputs) and probs.shape == (B, n_outputs)
    assert jnp.allclose(fc2, fc2_ref, atol=2e-2), "fc2 mismatch"
    assert jnp.allclose(sig, sig_ref, atol=1e-2), "sigmoid mismatch"
    assert jnp.allclose(probs, probs_ref, atol=1e-2), "softmax mismatch"
    assert jnp.allclose(jnp.sum(probs, axis=1), 1.0, atol=1e-5), "softmax not normalized"

    print("KERNEL_OK")
</pallas_src>

<mosaic_0001>
module attributes {stable_mosaic.version = 11 : i64} {
  func.func @classifier_kernel(%arg0: i32, %arg1: memref<2x1024xf32, #tpu.memory_space<vmem>>, %arg2: memref<1024x256xbf16, #tpu.memory_space<vmem>>, %arg3: memref<1x256xf32, #tpu.memory_space<vmem>>, %arg4: memref<256x10xbf16, #tpu.memory_space<vmem>>, %arg5: memref<1x10xf32, #tpu.memory_space<vmem>>, %arg6: memref<2x10xf32, #tpu.memory_space<vmem>>, %arg7: memref<2x10xf32, #tpu.memory_space<vmem>>, %arg8: memref<2x10xf32, #tpu.memory_space<vmem>>) attributes {dimension_semantics = [#tpu.dimension_semantics<parallel>], iteration_bounds = array<i64: 1>, scalar_prefetch = 0 : i64, scratch_operands = 0 : i64, tpu.core_type = #tpu.core_type<tc>, window_params = [{transform_indices = @transform_0, window_bounds = array<i64: 2, 1024>}, {pipeline_mode = #tpu.pipeline_mode<synchronous>, transform_indices = @transform_1, window_bounds = array<i64: 1024, 256>}, {pipeline_mode = #tpu.pipeline_mode<synchronous>, transform_indices = @transform_2, window_bounds = array<i64: 1, 256>}, {pipeline_mode = #tpu.pipeline_mode<synchronous>, transform_indices = @transform_3, window_bounds = array<i64: 256, 10>}, {pipeline_mode = #tpu.pipeline_mode<synchronous>, transform_indices = @transform_4, window_bounds = array<i64: 1, 10>}, {transform_indices = @transform_5, window_bounds = array<i64: 2, 10>}, {transform_indices = @transform_6, window_bounds = array<i64: 2, 10>}, {transform_indices = @transform_7, window_bounds = array<i64: 2, 10>}]} {
    %c0 = arith.constant 0 : index
    %c0_0 = arith.constant 0 : index
    %0 = vector.load %arg1[%c0, %c0_0] : memref<2x1024xf32, #tpu.memory_space<vmem>>, vector<2x1024xf32>
    %1 = arith.truncf %0 : vector<2x1024xf32> to vector<2x1024xbf16>
    %c0_1 = arith.constant 0 : index
    %c0_2 = arith.constant 0 : index
    %2 = vector.load %arg2[%c0_1, %c0_2] : memref<1024x256xbf16, #tpu.memory_space<vmem>>, vector<1024x256xbf16>
    %cst = arith.constant dense<0.000000e+00> : vector<2x256xf32>
    %3 = tpu.matmul %1, %2, %cst {dimension_numbers = #tpu.dot_dimension_numbers<[1], [0], [0], [1], [0, 0, 1, 1], [], []>} : vector<2x1024xbf16>, vector<1024x256xbf16>, vector<2x256xf32> -> vector<2x256xf32>
    %c0_3 = arith.constant 0 : index
    %c0_4 = arith.constant 0 : index
    %4 = vector.load %arg3[%c0_3, %c0_4] : memref<1x256xf32, #tpu.memory_space<vmem>>, vector<1x256xf32>
    %5 = vector.broadcast %4 : vector<1x256xf32> to vector<2x256xf32>
    %6 = arith.addf %3, %5 : vector<2x256xf32>
    %cst_5 = arith.constant 0.000000e+00 : f32
    %7 = vector.broadcast %cst_5 : f32 to vector<2x256xf32>
    %8 = arith.maximumf %6, %7 : vector<2x256xf32>
    %9 = arith.truncf %8 : vector<2x256xf32> to vector<2x256xbf16>
    %c0_6 = arith.constant 0 : index
    %c0_7 = arith.constant 0 : index
    %10 = vector.load %arg4[%c0_6, %c0_7] : memref<256x10xbf16, #tpu.memory_space<vmem>>, vector<256x10xbf16>
    %cst_8 = arith.constant dense<0.000000e+00> : vector<2x10xf32>
    %11 = tpu.matmul %9, %10, %cst_8 {dimension_numbers = #tpu.dot_dimension_numbers<[1], [0], [0], [1], [0, 0, 1, 1], [], []>} : vector<2x256xbf16>, vector<256x10xbf16>, vector<2x10xf32> -> vector<2x10xf32>
    %c0_9 = arith.constant 0 : index
    %c0_10 = arith.constant 0 : index
    %12 = vector.load %arg5[%c0_9, %c0_10] : memref<1x10xf32, #tpu.memory_space<vmem>>, vector<1x10xf32>
    %13 = vector.broadcast %12 : vector<1x10xf32> to vector<2x10xf32>
    %14 = arith.addf %11, %13 : vector<2x10xf32>
    %15 = arith.negf %14 : vector<2x10xf32>
    %16 = math.exp %15 : vector<2x10xf32>
    %cst_11 = arith.constant 1.000000e+00 : f32
    %17 = vector.broadcast %cst_11 : f32 to vector<2x10xf32>
    %18 = arith.addf %17, %16 : vector<2x10xf32>
    %19 = arith.divf %17, %18 : vector<2x10xf32>
    %cst_12 = arith.constant dense<0xFF800000> : vector<2xf32>
    %20 = vector.multi_reduction <maximumf>, %19, %cst_12 [1] : vector<2x10xf32> to vector<2xf32>
    %21 = vector.shape_cast %20 : vector<2xf32> to vector<2x1xf32>
    %22 = vector.broadcast %21 : vector<2x1xf32> to vector<2x10xf32>
    %23 = arith.subf %19, %22 : vector<2x10xf32>
    %24 = math.exp %23 : vector<2x10xf32>
    %cst_13 = arith.constant dense<0.000000e+00> : vector<2xf32>
    %25 = vector.multi_reduction <add>, %24, %cst_13 [1] : vector<2x10xf32> to vector<2xf32>
    %26 = vector.shape_cast %25 : vector<2xf32> to vector<2x1xf32>
    %27 = vector.broadcast %26 : vector<2x1xf32> to vector<2x10xf32>
    %28 = arith.divf %24, %27 : vector<2x10xf32>
    %c0_14 = arith.constant 0 : index
    %c0_15 = arith.constant 0 : index
    %29 = vector.load %arg6[%c0_14, %c0_15] : memref<2x10xf32, #tpu.memory_space<vmem>>, vector<2x10xf32>
    tpu.vector_store %arg6[%c0_14, %c0_15], %19 {strides = array<i32>} : memref<2x10xf32, #tpu.memory_space<vmem>>, vector<2x10xf32>,
    %c0_16 = arith.constant 0 : index
    %c0_17 = arith.constant 0 : index
    %30 = vector.load %arg7[%c0_16, %c0_17] : memref<2x10xf32, #tpu.memory_space<vmem>>, vector<2x10xf32>
    tpu.vector_store %arg7[%c0_16, %c0_17], %28 {strides = array<i32>} : memref<2x10xf32, #tpu.memory_space<vmem>>, vector<2x10xf32>,
    %c0_18 = arith.constant 0 : index
    %c0_19 = arith.constant 0 : index
    %31 = vector.load %arg8[%c0_18, %c0_19] : memref<2x10xf32, #tpu.memory_space<vmem>>, vector<2x10xf32>
    tpu.vector_store %arg8[%c0_18, %c0_19], %14 {strides = array<i32>} : memref<2x10xf32, #tpu.memory_space<vmem>>, vector<2x10xf32>,
    return
  }
  func.func @transform_0(%arg0: i32) -> (i32, i32) {
    %c0_i32 = arith.constant 0 : i32
    %c0_i32_0 = arith.constant 0 : i32
    return %arg0, %c0_i32 : i32, i32
  }
  func.func @transform_1(%arg0: i32) -> (i32, i32) {
    %c0_i32 = arith.constant 0 : i32
    %c0_i32_0 = arith.constant 0 : i32
    %c0_i32_1 = arith.constant 0 : i32
    return %c0_i32, %c0_i32_0 : i32, i32
  }
  func.func @transform_2(%arg0: i32) -> (i32, i32) {
    %c0_i32 = arith.constant 0 : i32
    %c0_i32_0 = arith.constant 0 : i32
    %c0_i32_1 = arith.constant 0 : i32
    return %c0_i32, %c0_i32_0 : i32, i32
  }
  func.func @transform_3(%arg0: i32) -> (i32, i32) {
    %c0_i32 = arith.constant 0 : i32
    %c0_i32_0 = arith.constant 0 : i32
    %c0_i32_1 = arith.constant 0 : i32
    return %c0_i32, %c0_i32_0 : i32, i32
  }
  func.func @transform_4(%arg0: i32) -> (i32, i32) {
    %c0_i32 = arith.constant 0 : i32
    %c0_i32_0 = arith.constant 0 : i32
    %c0_i32_1 = arith.constant 0 : i32
    return %c0_i32, %c0_i32_0 : i32, i32
  }
  func.func @transform_5(%arg0: i32) -> (i32, i32) {
    %c0_i32 = arith.constant 0 : i32
    %c0_i32_0 = arith.constant 0 : i32
    return %arg0, %c0_i32 : i32, i32
  }
  func.func @transform_6(%arg0: i32) -> (i32, i32) {
    %c0_i32 = arith.constant 0 : i32
    %c0_i32_0 = arith.constant 0 : i32
    return %arg0, %c0_i32 : i32, i32
  }
  func.func @transform_7(%arg0: i32) -> (i32, i32) {
    %c0_i32 = arith.constant 0 : i32
    %c0_i32_0 = arith.constant 0 : i32
    return %arg0, %c0_i32 : i32, i32
  }
}

</mosaic_0001>

<bundles_post_ra>
// kernel: tpu_custom_call.1
= control target key start
LH: loop header
LB: loop body
LE: loop exit
PB: predicated region body
PF: predicated region fallthrough
CT: control target
= control target key end

     0   :  { %13 = vsyncpa [#allocation3], 0  ;;  %s2304_s0 = inlined_call_operand.vmem [shape: f32[2,1024], index: 0, kind: input, shape index: {}]   ;;  %s2305_s1 = inlined_call_operand.hbm [shape: bf16[1024,256], index: 1, kind: input, shape index: {}]   ;;  %s2306_s2 = inlined_call_operand.vmem [shape: f32[1,256], index: 2, kind: input, shape index: {}]   ;;  %s2307_s3 = inlined_call_operand.vmem [shape: bf16[256,10], index: 3, kind: input, shape index: {}]   ;;  %s2308_s4 = inlined_call_operand.vmem [shape: f32[1,10], index: 4, kind: input, shape index: {}]   ;;  %s2309_s5 = inlined_call_operand.hbm [shape: f32[2,10], index: 5, kind: output, shape index: {0}]   ;;  %s2310_s6 = inlined_call_operand.hbm [shape: f32[2,10], index: 6, kind: output, shape index: {1}]   ;;  %s2311_s7 = inlined_call_operand.hbm [shape: f32[2,10], index: 7, kind: output, shape index: {2}]  }
   0x1   :  { %14 = vsyncpa [#allocation4], 0 }
   0x2   :  { %15 = vsyncpa [#allocation7], 0  ;;  %s22_s26 = sshll.u32 %s2305_s1, 4  ;;  %s2149_s27 = smov [#allocation2]   ;;  %s23_s26 = int_to_ptr.hbm [resolvable:$true] %s22_s26 }
   0x3   :  { %s24_s28 = sshll.u32 %s2149_s27, 4  ;;  %s2150_s29 = smov 128   ;;  %s25_s28 = int_to_ptr.vmem [resolvable:$true] %s24_s28 }
   0x4   :  { %s2151_s30 = smov 8  }
   0x5   :  { %30 = dma.hbm_to_vmem [thread:$0]  %s23_s26, 16384, %s25_s28, [#allocation3], %s2150_s29, %s2150_s29, %s2151_s30  }
   0x6   :  { %2143 = dma.done.wait [#allocation3], 16384  }
   0x7   :  { %2144 = vsyncadd [#allocation3], 4294950912  ;;  %v1369_v0 = vld [vmem:[#allocation2 + $0x70] sm:$0xf]  ;;  %v1903_v1 = vld [vmem:[#allocation2 + $0x74] sm:$0xf0] }
   0x8   :  { %v1433_v2 = vld [vmem:[#allocation2 + $0xf0] sm:$0xf]  ;;  %v1370_v3 = vor.u32 %v1903_v1, %v1369_v0  ;;  %v1919_v4 = vld [vmem:[#allocation2 + $0xf4] sm:$0xf0]  ;;  %v1361_v11 = vld [vmem:[#allocation2 + $0x60] sm:$0xf] }
   0x9   :  { %v1497_v5 = vld [vmem:[#allocation2 + $0x170] sm:$0xf]  ;;  %v1935_v6 = vld [vmem:[#allocation2 + $0x174] sm:$0xf0]  ;;  %v1434_v7 = vor.u32 %v1919_v4, %v1433_v2  ;;  %v1901_v13 = vld [vmem:[#allocation2 + $0x64] sm:$0xf0] }
   0xa   :  { %v1498_v8 = vor.u32 %v1935_v6, %v1497_v5  ;;  %v1561_v9 = vld [vmem:[#allocation2 + $0x1f0] sm:$0xf]  ;;  %v1951_v10 = vld [vmem:[#allocation2 + $0x1f4] sm:$0xf0]  ;;  %846 = vmatpush.bf16.msra.mxu0 %v1370_v3  ;;  %v1425_v14 = vld [vmem:[#allocation2 + $0xe0] sm:$0xf]  ;;  %v1362_v16 = vor.u32 %v1901_v13, %v1361_v11 }
   0xb   :  { %v1562_v12 = vor.u32 %v1951_v10, %v1561_v9  ;;  %v1917_v15 = vld [vmem:[#allocation2 + $0xe4] sm:$0xf0]  ;;  %859 = vmatpush.bf16.msra.mxu1 %v1434_v7  ;;  %v1489_v18 = vld [vmem:[#allocation2 + $0x160] sm:$0xf]  ;;  %v1353_v23 = vld [vmem:[#allocation2 + $0x50] sm:$0xf] }
   0xc   :  { %872 = vmatpush.bf16.msra.mxu2 %v1498_v8  ;;  %v1426_v17 = vor.u32 %v1917_v15, %v1425_v14  ;;  %v1933_v19 = vld [vmem:[#allocation2 + $0x164] sm:$0xf0]  ;;  %v1553_v20 = vld [vmem:[#allocation2 + $0x1e0] sm:$0xf]  ;;  %v1899_v24 = vld [vmem:[#allocation2 + $0x54] sm:$0xf0] }
   0xd   :  { %885 = vmatpush.bf16.msra.mxu3 %v1562_v12  ;;  %v1490_v21 = vor.u32 %v1933_v19, %v1489_v18  ;;  %v1949_v22 = vld [vmem:[#allocation2 + $0x1e4] sm:$0xf0]  ;;  %v1417_v26 = vld [vmem:[#allocation2 + $0xd0] sm:$0xf]  ;;  %v1915_v27 = vld [vmem:[#allocation2 + $0xd4] sm:$0xf0]  ;;  %v1354_v29 = vor.u32 %v1899_v24, %v1353_v23 }
   0xe   :  { %v1554_v25 = vor.u32 %v1949_v22, %v1553_v20  ;;  %v1481_v28 = vld [vmem:[#allocation2 + $0x150] sm:$0xf]  ;;  %847 = vmatpush.bf16.msra.mxu0 %v1362_v16  ;;  %v1931_v30 = vld [vmem:[#allocation2 + $0x154] sm:$0xf0]  ;;  %v1418_v33 = vor.u32 %v1915_v27, %v1417_v26  ;;  %v1345_v35 = vld [vmem:[#allocation2 + $0x40] sm:$0xf] }
   0xf   :  { %v1545_v31 = vld [vmem:[#allocation2 + $0x1d0] sm:$0xf]  ;;  %v1947_v32 = vld [vmem:[#allocation2 + $0x1d4] sm:$0xf0]  ;;  %860 = vmatpush.bf16.msra.mxu1 %v1426_v17  ;;  %v1482_v34 = vor.u32 %v1931_v30, %v1481_v28  ;;  %v1897_v36 = vld [vmem:[#allocation2 + $0x44] sm:$0xf0] }
  0x10   :  { %873 = vmatpush.bf16.msra.mxu2 %v1490_v21  ;;  %v1409_v37 = vld [vmem:[#allocation2 + $0xc0] sm:$0xf]  ;;  %v1546_v38 = vor.u32 %v1947_v32, %v1545_v31  ;;  %v1913_v39 = vld [vmem:[#allocation2 + $0xc4] sm:$0xf0]  ;;  %v1346_v44 = vor.u32 %v1897_v36, %v1345_v35  ;;  %v1337_v47 = vld [vmem:[#allocation2 + $0x30] sm:$0xf] }
  0x11   :  { %886 = vmatpush.bf16.msra.mxu3 %v1554_v25  ;;  %v1473_v40 = vld [vmem:[#allocation2 + $0x140] sm:$0xf]  ;;  %v1929_v41 = vld [vmem:[#allocation2 + $0x144] sm:$0xf0]  ;;  %v1410_v45 = vor.u32 %v1913_v39, %v1409_v37  ;;  %v1895_v48 = vld [vmem:[#allocation2 + $0x34] sm:$0xf0] }
  0x12   :  { %v1537_v42 = vld [vmem:[#allocation2 + $0x1c0] sm:$0xf]  ;;  %v1945_v43 = vld [vmem:[#allocation2 + $0x1c4] sm:$0xf0]  ;;  %848 = vmatpush.bf16.msra.mxu0 %v1354_v29  ;;  %v1474_v46 = vor.u32 %v1929_v41, %v1473_v40  ;;  %v1401_v49 = vld [vmem:[#allocation2 + $0xb0] sm:$0xf]  ;;  %v1338_v56 = vor.u32 %v1895_v48, %v1337_v47 }
  0x13   :  { %861 = vmatpush.bf16.msra.mxu1 %v1418_v33  ;;  %v1538_v50 = vor.u32 %v1945_v43, %v1537_v42  ;;  %v1911_v51 = vld [vmem:[#allocation2 + $0xb4] sm:$0xf0]  ;;  %v1465_v52 = vld [vmem:[#allocation2 + $0x130] sm:$0xf]  ;;  %v1329_v59 = vld [vmem:[#allocation2 + $0x20] sm:$0xf] }
  0x14   :  { %874 = vmatpush.bf16.msra.mxu2 %v1482_v34  ;;  %v1927_v53 = vld [vmem:[#allocation2 + $0x134] sm:$0xf0]  ;;  %v1529_v54 = vld [vmem:[#allocation2 + $0x1b0] sm:$0xf]  ;;  %v1402_v57 = vor.u32 %v1911_v51, %v1401_v49  ;;  %v1893_v60 = vld [vmem:[#allocation2 + $0x24] sm:$0xf0] }
  0x15   :  { %887 = vmatpush.bf16.msra.mxu3 %v1546_v38  ;;  %v1943_v55 = vld [vmem:[#allocation2 + $0x1b4] sm:$0xf0]  ;;  %v1466_v58 = vor.u32 %v1927_v53, %v1465_v52  ;;  %v1393_v61 = vld [vmem:[#allocation2 + $0xa0] sm:$0xf]  ;;  %v1909_v63 = vld [vmem:[#allocation2 + $0xa4] sm:$0xf0]  ;;  %v1330_v4 = vor.u32 %v1893_v60, %v1329_v59 }
  0x16   :  { %849 = vmatpush.bf16.msra.mxu0 %v1346_v44  ;;  %v1530_v62 = vor.u32 %v1943_v55, %v1529_v54  ;;  %v1457_v0 = vld [vmem:[#allocation2 + $0x120] sm:$0xf]  ;;  %v1925_v1 = vld [vmem:[#allocation2 + $0x124] sm:$0xf0]  ;;  %v1394_v5 = vor.u32 %v1909_v63, %v1393_v61  ;;  %v1321_v7 = vld [vmem:[#allocation2 + $0x10] sm:$0xf] }
  0x17   :  { %862 = vmatpush.bf16.msra.mxu1 %v1410_v45  ;;  %v1521_v2 = vld [vmem:[#allocation2 + $0x1a0] sm:$0xf]  ;;  %v1941_v3 = vld [vmem:[#allocation2 + $0x1a4] sm:$0xf0]  ;;  %v1458_v6 = vor.u32 %v1925_v1, %v1457_v0  ;;  %v1891_v8 = vld [vmem:[#allocation2 + $0x14] sm:$0xf0] }
  0x18   :  { %875 = vmatpush.bf16.msra.mxu2 %v1474_v46  ;;  %v1385_v9 = vld [vmem:[#allocation2 + $0x90] sm:$0xf]  ;;  %v1522_v10 = vor.u32 %v1941_v3, %v1521_v2  ;;  %v1907_v11 = vld [vmem:[#allocation2 + $0x94] sm:$0xf0]  ;;  %v1322_v16 = vor.u32 %v1891_v8, %v1321_v7  ;;  %v1313_v17 = vld [vmem:[#allocation2] sm:$0xf] }
  0x19   :  { %888 = vmatpush.bf16.msra.mxu3 %v1538_v50  ;;  %v1449_v12 = vld [vmem:[#allocation2 + $0x110] sm:$0xf]  ;;  %v1923_v13 = vld [vmem:[#allocation2 + $0x114] sm:$0xf0]  ;;  %v1889_v18 = vld [vmem:[#allocation2 + $0x4] sm:$0xf0]  ;;  %v1386_v19 = vor.u32 %v1907_v11, %v1385_v9 }
  0x1a   :  { %850 = vmatpush.bf16.msra.mxu0 %v1338_v56  ;;  %v1513_v14 = vld [vmem:[#allocation2 + $0x190] sm:$0xf]  ;;  %v1939_v15 = vld [vmem:[#allocation2 + $0x194] sm:$0xf0]  ;;  %v1450_v20 = vor.u32 %v1923_v13, %v1449_v12  ;;  %v1377_v21 = vld [vmem:[#allocation2 + $0x80] sm:$0xf]  ;;  %v1314_v31 = vor.u32 %v1889_v18, %v1313_v17 }
  0x1b   :  { %863 = vmatpush.bf16.msra.mxu1 %v1402_v57  ;;  %v1905_v22 = vld [vmem:[#allocation2 + $0x84] sm:$0xf0]  ;;  %v1441_v23 = vld [vmem:[#allocation2 + $0x100] sm:$0xf]  ;;  %v1514_v24 = vor.u32 %v1939_v15, %v1513_v14  ;;  %v1625_v28 = vld [vmem:[#allocation2 + $0x270] sm:$0xf] }
  0x1c   :  { %876 = vmatpush.bf16.msra.mxu2 %v1466_v58  ;;  %v1921_v25 = vld [vmem:[#allocation2 + $0x104] sm:$0xf0]  ;;  %v1505_v26 = vld [vmem:[#allocation2 + $0x180] sm:$0xf]  ;;  %v1967_v29 = vld [vmem:[#allocation2 + $0x274] sm:$0xf0]  ;;  %v1378_v35 = vor.u32 %v1905_v22, %v1377_v21 }
  0x1d   :  { %889 = vmatpush.bf16.msra.mxu3 %v1530_v62  ;;  %v1937_v27 = vld [vmem:[#allocation2 + $0x184] sm:$0xf0]  ;;  %v1689_v30 = vld [vmem:[#allocation2 + $0x2f0] sm:$0xf]  ;;  %v1983_v32 = vld [vmem:[#allocation2 + $0x2f4] sm:$0xf0]  ;;  %v1442_v36 = vor.u32 %v1921_v25, %v1441_v23  ;;  %v1626_v40 = vor.u32 %v1967_v29, %v1625_v28 }
  0x1e   :  { %851 = vmatpush.bf16.msra.mxu0 %v1330_v4  ;;  %v1753_v33 = vld [vmem:[#allocation2 + $0x370] sm:$0xf]  ;;  %v1999_v34 = vld [vmem:[#allocation2 + $0x374] sm:$0xf0]  ;;  %v1506_v39 = vor.u32 %v1937_v27, %v1505_v26  ;;  %v1690_v41 = vor.u32 %v1983_v32, %v1689_v30  ;;  %v1617_v43 = vld [vmem:[#allocation2 + $0x260] sm:$0xf] }
  0x1f   :  { %864 = vmatpush.bf16.msra.mxu1 %v1394_v5  ;;  %v1817_v37 = vld [vmem:[#allocation2 + $0x3f0] sm:$0xf]  ;;  %v2015_v38 = vld [vmem:[#allocation2 + $0x3f4] sm:$0xf0]  ;;  %v1754_v42 = vor.u32 %v1999_v34, %v1753_v33  ;;  %v1965_v44 = vld [vmem:[#allocation2 + $0x264] sm:$0xf0] }
  0x20   :  { %877 = vmatpush.bf16.msra.mxu2 %v1458_v6  ;;  %v1681_v45 = vld [vmem:[#allocation2 + $0x2e0] sm:$0xf]  ;;  %v1818_v46 = vor.u32 %v2015_v38, %v1817_v37  ;;  %v1981_v47 = vld [vmem:[#allocation2 + $0x2e4] sm:$0xf0]  ;;  %v41_v52 = vld [vmem:[%s2304_s0] sm:$0xff]  ;;  %v1618_v53 = vor.u32 %v1965_v44, %v1617_v43  ;;  %vm1235_vm0 = vcmask 74752  }
  0x21   :  { %890 = vmatpush.bf16.msra.mxu3 %v1522_v10  ;;  %v1745_v48 = vld [vmem:[#allocation2 + $0x360] sm:$0xf]  ;;  %v1997_v49 = vld [vmem:[#allocation2 + $0x364] sm:$0xf0]  ;;  %45 = vst [vmem:[#allocation1] ss:$4 sm:$0xff] %v41_v52  ;;  %v1682_v54 = vor.u32 %v1981_v47, %v1681_v45 }
  0x22   :  { %852 = vmatpush.bf16.msra.mxu0 %v1322_v16  ;;  %v1809_v50 = vld [vmem:[#allocation2 + $0x3e0] sm:$0xf]  ;;  %v2013_v51 = vld [vmem:[#allocation2 + $0x3e4] sm:$0xf0]  ;;  %v1746_v55 = vor.u32 %v1997_v49, %v1745_v48  ;;  %v1609_v56 = vld [vmem:[#allocation2 + $0x250] sm:$0xf] }
  0x23   :  { %865 = vmatpush.bf16.msra.mxu1 %v1386_v19  ;;  %v1963_v57 = vld [vmem:[#allocation2 + $0x254] sm:$0xf0]  ;;  %v1673_v58 = vld [vmem:[#allocation2 + $0x2d0] sm:$0xf]  ;;  %v1810_v59 = vor.u32 %v2013_v51, %v1809_v50  ;;  %v1601_v2 = vld [vmem:[#allocation2 + $0x240] sm:$0xf] }
  0x24   :  { %878 = vmatpush.bf16.msra.mxu2 %v1450_v20  ;;  %v1979_v60 = vld [vmem:[#allocation2 + $0x2d4] sm:$0xf0]  ;;  %v1737_v61 = vld [vmem:[#allocation2 + $0x350] sm:$0xf]  ;;  %v1610_v1 = vor.u32 %v1963_v57, %v1609_v56  ;;  %v1961_v3 = vld [vmem:[#allocation2 + $0x244] sm:$0xf0] }
  0x25   :  { %891 = vmatpush.bf16.msra.mxu3 %v1514_v24  ;;  %v1995_v62 = vld [vmem:[#allocation2 + $0x354] sm:$0xf0]  ;;  %v1801_v63 = vld [vmem:[#allocation2 + $0x3d0] sm:$0xf]  ;;  %v1674_v4 = vor.u32 %v1979_v60, %v1673_v58  ;;  %v1665_v6 = vld [vmem:[#allocation2 + $0x2c0] sm:$0xf]  ;;  %v1602_v15 = vor.u32 %v1961_v3, %v1601_v2 }
  0x26   :  { %853 = vmatpush.bf16.msra.mxu0 %v1314_v31  ;;  %v2011_v0 = vld [vmem:[#allocation2 + $0x3d4] sm:$0xf0]  ;;  %v1738_v5 = vor.u32 %v1995_v62, %v1737_v61  ;;  %v1977_v7 = vld [vmem:[#allocation2 + $0x2c4] sm:$0xf0]  ;;  %v1729_v8 = vld [vmem:[#allocation2 + $0x340] sm:$0xf] }
  0x27   :  { %866 = vmatpush.bf16.msra.mxu1 %v1378_v35  ;;  %v1802_v9 = vor.u32 %v2011_v0, %v1801_v63  ;;  %v1993_v10 = vld [vmem:[#allocation2 + $0x344] sm:$0xf0]  ;;  %v1793_v11 = vld [vmem:[#allocation2 + $0x3c0] sm:$0xf]  ;;  %v1666_v16 = vor.u32 %v1977_v7, %v1665_v6  ;;  %v1593_v22 = vld [vmem:[#allocation2 + $0x230] sm:$0xf] }
  0x28   :  { %879 = vmatpush.bf16.msra.mxu2 %v1442_v36  ;;  %v2009_v12 = vld [vmem:[#allocation2 + $0x3c4] sm:$0xf0]  ;;  %v48_v14 = vld.sshfl [vmem:[#allocation1] sm:$0xff pattern:$0x73625140]  ;;  %v1730_v21 = vor.u32 %v1993_v10, %v1729_v8  ;;  %v42_v45 = vld [vmem:[%s2304_s0 + $0x8] sm:$0xff] }
  0x29   :  { %892 = vmatpush.bf16.msra.mxu3 %v1506_v39  ;;  %v50_v13 = vld.sshfl [vmem:[#allocation1 + $0x10] sm:$0xff pattern:$0x73625140]  ;;  %v2203_v18 = vpack.c.bf16 %v48_v14, %v48_v14  ;;  %v51_v19 = vld.sshfl [vmem:[#allocation1 + $0x18] sm:$0xff pattern:$0x73625140]  ;;  %v1794_v27 = vor.u32 %v2009_v12, %v1793_v11 }
  0x2a   :  { %898 = vmatpush.bf16.msrb.mxu0 %v1626_v40  ;;  %v2201_v17 = vpack.c.bf16 %v50_v13, %v50_v13  ;;  %v49_v20 = vld.sshfl [vmem:[#allocation1 + $0x8] sm:$0xff pattern:$0x73625140]  ;;  %v1959_v23 = vld [vmem:[#allocation2 + $0x234] sm:$0xf0]  ;;  %v2205_v25 = vpack.c.bf16 %v51_v19, %v51_v19  ;;  %s1270_s20 = sshll.u32 %s2309_s5, 4  ;;  %s1271_s20 = int_to_ptr.hbm [resolvable:$true] %s1270_s20 }
  0x2b   :  { %911 = vmatpush.bf16.msrb.mxu1 %v1690_v41  ;;  %v1657_v24 = vld [vmem:[#allocation2 + $0x2b0] sm:$0xf]  ;;  %v2207_v26 = vpack.c.bf16 %v49_v20, %v49_v20  ;;  %v1975_v28 = vld [vmem:[#allocation2 + $0x2b4] sm:$0xf0]  ;;  %854 = vmatmul.bf16.vlgmr.msra.gmra.mxu0 %v2203_v18  ;;  %v1594_v33 = vor.u32 %v1959_v23, %v1593_v22  ;;  %v1585_v36 = vld [vmem:[#allocation2 + $0x220] sm:$0xf] }
  0x2c   :  { %924 = vmatpush.bf16.msrb.mxu2 %v1754_v42  ;;  %v1721_v29 = vld [vmem:[#allocation2 + $0x330] sm:$0xf]  ;;  %v1991_v30 = vld [vmem:[#allocation2 + $0x334] sm:$0xf0]  ;;  %893 = vmatmul.bf16.vlgmr.msra.gmra.mxu3 %v2205_v25  ;;  %v1658_v34 = vor.u32 %v1975_v28, %v1657_v24  ;;  %v1957_v37 = vld [vmem:[#allocation2 + $0x224] sm:$0xf0] }
  0x2d   :  { %937 = vmatpush.bf16.msrb.mxu3 %v1818_v46  ;;  %880 = vmatmul.bf16.vlgmr.msra.gmra.mxu2 %v2201_v17  ;;  %v1785_v31 = vld [vmem:[#allocation2 + $0x3b0] sm:$0xf]  ;;  %v2007_v32 = vld [vmem:[#allocation2 + $0x3b4] sm:$0xf0]  ;;  %v1722_v35 = vor.u32 %v1991_v30, %v1721_v29  ;;  %v1649_v38 = vld [vmem:[#allocation2 + $0x2a0] sm:$0xf]  ;;  %v1586_v46 = vor.u32 %v1957_v37, %v1585_v36 }
  0x2e   :  { %899 = vmatpush.bf16.msrb.mxu0 %v1618_v53  ;;  %867 = vmatmul.bf16.vlgmr.msra.gmra.mxu1 %v2207_v26  ;;  %v1786_v39 = vor.u32 %v2007_v32, %v1785_v31  ;;  %v1973_v40 = vld [vmem:[#allocation2 + $0x2a4] sm:$0xf0]  ;;  %v1713_v41 = vld [vmem:[#allocation2 + $0x320] sm:$0xf]  ;;  %47 = vst [vmem:[#allocation1 + $0x20] ss:$4 sm:$0xff] %v42_v45 }
  0x2f   :  { %912 = vmatpush.bf16.msrb.mxu1 %v1682_v54  ;;  %v1989_v42 = vld [vmem:[#allocation2 + $0x324] sm:$0xf0]  ;;  %v1777_v43 = vld [vmem:[#allocation2 + $0x3a0] sm:$0xf]  ;;  %v1650_v47 = vor.u32 %v1973_v40, %v1649_v38  ;;  %v1577_v49 = vld [vmem:[#allocation2 + $0x210] sm:$0xf] }
  0x30   :  { %925 = vmatpush.bf16.msrb.mxu2 %v1746_v55  ;;  %v2005_v44 = vld [vmem:[#allocation2 + $0x3a4] sm:$0xf0]  ;;  %v1714_v48 = vor.u32 %v1989_v42, %v1713_v41  ;;  %v1955_v50 = vld [vmem:[#allocation2 + $0x214] sm:$0xf0]  ;;  %v1641_v51 = vld [vmem:[#allocation2 + $0x290] sm:$0xf] }
  0x31   :  { %938 = vmatpush.bf16.msrb.mxu3 %v1810_v59  ;;  %v1778_v52 = vor.u32 %v2005_v44, %v1777_v43  ;;  %v1971_v53 = vld [vmem:[#allocation2 + $0x294] sm:$0xf0]  ;;  %v1705_v54 = vld [vmem:[#allocation2 + $0x310] sm:$0xf]  ;;  %v1569_v58 = vld [vmem:[#allocation2 + $0x200] sm:$0xf]  ;;  %v1578_v59 = vor.u32 %v1955_v50, %v1577_v49 }
  0x32   :  { %900 = vmatpush.bf16.msrb.mxu0 %v1610_v1  ;;  %v1987_v55 = vld [vmem:[#allocation2 + $0x314] sm:$0xf0]  ;;  %v1769_v56 = vld [vmem:[#allocation2 + $0x390] sm:$0xf]  ;;  %v1953_v60 = vld [vmem:[#allocation2 + $0x204] sm:$0xf0]  ;;  %v1642_v63 = vor.u32 %v1971_v53, %v1641_v51 }
  0x33   :  { %913 = vmatpush.bf16.msrb.mxu1 %v1674_v4  ;;  %v2003_v57 = vld [vmem:[#allocation2 + $0x394] sm:$0xf0]  ;;  %v1633_v61 = vld [vmem:[#allocation2 + $0x280] sm:$0xf]  ;;  %v1969_v62 = vld [vmem:[#allocation2 + $0x284] sm:$0xf0]  ;;  %v1706_v0 = vor.u32 %v1987_v55, %v1705_v54  ;;  %v1570_v11 = vor.u32 %v1953_v60, %v1569_v58 }
  0x34   :  { %926 = vmatpush.bf16.msrb.mxu2 %v1738_v5  ;;  %v1697_v1 = vld [vmem:[#allocation2 + $0x300] sm:$0xf]  ;;  %v1985_v2 = vld [vmem:[#allocation2 + $0x304] sm:$0xf0]  ;;  %v1770_v4 = vor.u32 %v2003_v57, %v1769_v56  ;;  %v1902_v6 = vld [vmem:[#allocation2 + $0x74] sm:$0xf] }
  0x35   :  { %939 = vmatpush.bf16.msrb.mxu3 %v1802_v9  ;;  %v1761_v3 = vld [vmem:[#allocation2 + $0x380] sm:$0xf]  ;;  %v2001_v5 = vld [vmem:[#allocation2 + $0x384] sm:$0xf0]  ;;  %v1371_v7 = vld [vmem:[#allocation2 + $0x78] sm:$0xf0] }
  0x36   :  { %901 = vmatpush.bf16.msrb.mxu0 %v1602_v15  ;;  %v1918_v8 = vld [vmem:[#allocation2 + $0xf4] sm:$0xf]  ;;  %v1435_v9 = vld [vmem:[#allocation2 + $0xf8] sm:$0xf0]  ;;  %v1634_v15 = vor.u32 %v1969_v62, %v1633_v61  ;;  %v1900_v20 = vld [vmem:[#allocation2 + $0x64] sm:$0xf]  ;;  %v1762_v22 = vor.u32 %v2001_v5, %v1761_v3  ;;  %v1374_v23 = vor.u32 %v1902_v6, %v1371_v7 }
  0x37   :  { %914 = vmatpush.bf16.msrb.mxu1 %v1666_v16  ;;  %v1934_v10 = vld [vmem:[#allocation2 + $0x174] sm:$0xf]  ;;  %v1499_v12 = vld [vmem:[#allocation2 + $0x178] sm:$0xf0]  ;;  %v1698_v16 = vor.u32 %v1985_v2, %v1697_v1  ;;  %v1438_v28 = vor.u32 %v1918_v8, %v1435_v9  ;;  %v1916_v30 = vld [vmem:[#allocation2 + $0xe4] sm:$0xf] }
  0x38   :  { %927 = vmatpush.bf16.msrb.mxu2 %v1730_v21  ;;  %v1950_v13 = vld [vmem:[#allocation2 + $0x1f4] sm:$0xf]  ;;  %v1563_v14 = vld [vmem:[#allocation2 + $0x1f8] sm:$0xf0]  ;;  %v1363_v21 = vld [vmem:[#allocation2 + $0x68] sm:$0xf0]  ;;  %v1502_v29 = vor.u32 %v1934_v10, %v1499_v12 }
  0x39   :  { %940 = vmatpush.bf16.msrb.mxu3 %v1794_v27  ;;  %v54_v19 = vld.sshfl [vmem:[#allocation1 + $0x30] sm:$0xff pattern:$0x73625140]  ;;  %v52_v24 = vld.sshfl [vmem:[#allocation1 + $0x20] sm:$0xff pattern:$0x73625140]  ;;  %v1566_v32 = vor.u32 %v1950_v13, %v1563_v14  ;;  %v1366_v41 = vor.u32 %v1900_v20, %v1363_v21 }
  0x3a   :  { %902 = vmatpush.bf16.msrb.mxu0 %v1594_v33  ;;  %v55_v27 = vld.sshfl [vmem:[#allocation1 + $0x38] sm:$0xff pattern:$0x73625140]  ;;  %v53_v31 = vld.sshfl [vmem:[#allocation1 + $0x28] sm:$0xff pattern:$0x73625140]  ;;  %v2216_v33 = vpack.c.bf16 %v54_v19, %v54_v19  ;;  %v2218_v37 = vpack.c.bf16 %v52_v24, %v52_v24 }
  0x3b   :  { %915 = vmatpush.bf16.msrb.mxu1 %v1658_v34  ;;  %v1427_v34 = vld [vmem:[#allocation2 + $0xe8] sm:$0xf0]  ;;  %v2220_v38 = vpack.c.bf16 %v55_v27, %v55_v27  ;;  %v2222_v42 = vpack.c.bf16 %v53_v31, %v53_v31  ;;  %v1898_v45 = vld [vmem:[#allocation2 + $0x54] sm:$0xf]  ;;  %v1419_v49 = vld [vmem:[#allocation2 + $0xd8] sm:$0xf0] }
  0x3c   :  { %928 = vmatpush.bf16.msrb.mxu2 %v1722_v35  ;;  %v1932_v35 = vld [vmem:[#allocation2 + $0x164] sm:$0xf]  ;;  %v1491_v36 = vld [vmem:[#allocation2 + $0x168] sm:$0xf0]  ;;  %v1430_v43 = vor.u32 %v1916_v30, %v1427_v34  ;;  %v1930_v50 = vld [vmem:[#allocation2 + $0x154] sm:$0xf] }
  0x3d   :  { %941 = vmatpush.bf16.msrb.mxu3 %v1786_v39  ;;  %v1948_v39 = vld [vmem:[#allocation2 + $0x1e4] sm:$0xf]  ;;  %v1555_v40 = vld [vmem:[#allocation2 + $0x1e8] sm:$0xf0]  ;;  %v1494_v44 = vor.u32 %v1932_v35, %v1491_v36  ;;  %v1483_v51 = vld [vmem:[#allocation2 + $0x158] sm:$0xf0] }
  0x3e   :  { %903 = vmatpush.bf16.msrb.mxu0 %v1586_v46  ;;  %v1355_v46 = vld [vmem:[#allocation2 + $0x58] sm:$0xf0]  ;;  %v1486_v56 = vor.u32 %v1930_v50, %v1483_v51  ;;  %v1896_v57 = vld [vmem:[#allocation2 + $0x44] sm:$0xf]  ;;  %v1347_v58 = vld [vmem:[#allocation2 + $0x48] sm:$0xf0] }
  0x3f   :  { %916 = vmatpush.bf16.msrb.mxu1 %v1650_v47  ;;  %v1914_v47 = vld [vmem:[#allocation2 + $0xd4] sm:$0xf]  ;;  %v1547_v53 = vld [vmem:[#allocation2 + $0x1d8] sm:$0xf0]  ;;  %v1358_v54 = vor.u32 %v1898_v45, %v1355_v46  ;;  %v1411_v61 = vld [vmem:[#allocation2 + $0xc8] sm:$0xf0]  ;;  %v1350_v2 = vor.u32 %v1896_v57, %v1347_v58 }
  0x40   :  { %929 = vmatpush.bf16.msrb.mxu2 %v1714_v48  ;;  %v1558_v48 = vor.u32 %v1948_v39, %v1555_v40  ;;  %v1422_v55 = vor.u32 %v1914_v47, %v1419_v49  ;;  %v1928_v62 = vld [vmem:[#allocation2 + $0x144] sm:$0xf]  ;;  %v1539_v1 = vld [vmem:[#allocation2 + $0x1c8] sm:$0xf0]  ;;  %v1894_v5 = vld [vmem:[#allocation2 + $0x34] sm:$0xf] }
  0x41   :  { %942 = vmatpush.bf16.msrb.mxu3 %v1778_v52  ;;  %v1946_v52 = vld [vmem:[#allocation2 + $0x1d4] sm:$0xf]  ;;  %v1339_v6 = vld [vmem:[#allocation2 + $0x38] sm:$0xf0]  ;;  %v1892_v19 = vld [vmem:[#allocation2 + $0x24] sm:$0xf] }
  0x42   :  { %904 = vmatpush.bf16.msrb.mxu0 %v1578_v59  ;;  %v1912_v59 = vld [vmem:[#allocation2 + $0xc4] sm:$0xf]  ;;  %v1550_v60 = vor.u32 %v1946_v52, %v1547_v53  ;;  %v1910_v7 = vld [vmem:[#allocation2 + $0xb4] sm:$0xf]  ;;  %v1403_v9 = vld [vmem:[#allocation2 + $0xb8] sm:$0xf0]  ;;  %v1342_v14 = vor.u32 %v1894_v5, %v1339_v6 }
  0x43   :  { %917 = vmatpush.bf16.msrb.mxu1 %v1642_v63  ;;  %v1475_v63 = vld [vmem:[#allocation2 + $0x148] sm:$0xf0]  ;;  %v1414_v3 = vor.u32 %v1912_v59, %v1411_v61  ;;  %v1926_v10 = vld [vmem:[#allocation2 + $0x134] sm:$0xf]  ;;  %v1531_v13 = vld [vmem:[#allocation2 + $0x1b8] sm:$0xf0] }
  0x44   :  { %930 = vmatpush.bf16.msrb.mxu2 %v1706_v0  ;;  %v1944_v0 = vld [vmem:[#allocation2 + $0x1c4] sm:$0xf]  ;;  %v1942_v12 = vld [vmem:[#allocation2 + $0x1b4] sm:$0xf]  ;;  %v1331_v20 = vld [vmem:[#allocation2 + $0x28] sm:$0xf0] }
  0x45   :  { %943 = vmatpush.bf16.msrb.mxu3 %v1770_v4  ;;  %v1478_v4 = vor.u32 %v1928_v62, %v1475_v63  ;;  %v1542_v8 = vor.u32 %v1944_v0, %v1539_v1  ;;  %v1908_v21 = vld [vmem:[#allocation2 + $0xa4] sm:$0xf]  ;;  %v1459_v27 = vld [vmem:[#allocation2 + $0x128] sm:$0xf0]  ;;  %v1334_v30 = vor.u32 %v1892_v19, %v1331_v20  ;;  %v1890_v34 = vld [vmem:[#allocation2 + $0x14] sm:$0xf] }
  0x46   :  { %905 = vmatpush.bf16.msrb.mxu0 %v1570_v11  ;;  %v1467_v11 = vld [vmem:[#allocation2 + $0x138] sm:$0xf0]  ;;  %v1924_v24 = vld [vmem:[#allocation2 + $0x124] sm:$0xf]  ;;  %v1906_v36 = vld [vmem:[#allocation2 + $0x94] sm:$0xf] }
  0x47   :  { %918 = vmatpush.bf16.msrb.mxu1 %v1634_v15  ;;  %v1406_v15 = vor.u32 %v1910_v7, %v1403_v9  ;;  %v1323_v35 = vld [vmem:[#allocation2 + $0x18] sm:$0xf0]  ;;  %v1888_v47 = vld [vmem:[#allocation2 + $0x4] sm:$0xf]  ;;  %v1379_v52 = vld [vmem:[#allocation2 + $0x88] sm:$0xf0] }
  0x48   :  { %931 = vmatpush.bf16.msrb.mxu2 %v1698_v16  ;;  %v1470_v16 = vor.u32 %v1926_v10, %v1467_v11  ;;  %v1387_v40 = vld [vmem:[#allocation2 + $0x98] sm:$0xf0]  ;;  %v1326_v46 = vor.u32 %v1890_v34, %v1323_v35  ;;  %v1904_v51 = vld [vmem:[#allocation2 + $0x84] sm:$0xf]  ;;  %v1507_v57 = vld [vmem:[#allocation2 + $0x188] sm:$0xf0] }
  0x49   :  { %944 = vmatpush.bf16.msrb.mxu3 %v1762_v22  ;;  %906 = vmatmul.bf16.vlgmr.msrb.gmra.mxu0 %v2218_v37  ;;  %v1534_v22 = vor.u32 %v1942_v12, %v1531_v13  ;;  %v1515_v45 = vld [vmem:[#allocation2 + $0x198] sm:$0xf0]  ;;  %v1390_v49 = vor.u32 %v1906_v36, %v1387_v40  ;;  %v1920_v53 = vld [vmem:[#allocation2 + $0x104] sm:$0xf]  ;;  %v1966_v58 = vld [vmem:[#allocation2 + $0x274] sm:$0xf]  ;;  %v1382_v1 = vor.u32 %v1904_v51, %v1379_v52 }
  0x4a   :  { %950 = vmatpush.bf16.msra.mxu0 %v1374_v23  ;;  %919 = vmatmul.bf16.vlgmr.msrb.gmra.mxu1 %v2222_v42  ;;  %v1395_v23 = vld [vmem:[#allocation2 + $0xa8] sm:$0xf0]  ;;  %v1627_v59 = vld [vmem:[#allocation2 + $0x278] sm:$0xf0]  ;;  %v1998_v63 = vld [vmem:[#allocation2 + $0x374] sm:$0xf] }
  0x4b   :  { %963 = vmatpush.bf16.msra.mxu1 %v1438_v28  ;;  %932 = vmatmul.bf16.vlgmr.msrb.gmra.mxu2 %v2216_v33  ;;  %v1940_v28 = vld [vmem:[#allocation2 + $0x1a4] sm:$0xf]  ;;  %v1398_v31 = vor.u32 %v1908_v21, %v1395_v23  ;;  %v1691_v62 = vld [vmem:[#allocation2 + $0x2f8] sm:$0xf0]  ;;  %v1630_v6 = vor.u32 %v1966_v58, %v1627_v59  ;;  %v1619_v10 = vld [vmem:[#allocation2 + $0x268] sm:$0xf0] }
  0x4c   :  { %976 = vmatpush.bf16.msra.mxu2 %v1502_v29  ;;  %945 = vmatmul.bf16.vlgmr.msrb.gmra.mxu3 %v2220_v38  ;;  %v1523_v29 = vld [vmem:[#allocation2 + $0x1a8] sm:$0xf0]  ;;  %v1755_v0 = vld [vmem:[#allocation2 + $0x378] sm:$0xf0]  ;;  %v1964_v7 = vld [vmem:[#allocation2 + $0x264] sm:$0xf] }
  0x4d   :  { %989 = vmatpush.bf16.msra.mxu3 %v1566_v32  ;;  %v1462_v32 = vor.u32 %v1924_v24, %v1459_v27  ;;  %v1526_v39 = vor.u32 %v1940_v28, %v1523_v29  ;;  %v1758_v9 = vor.u32 %v1998_v63, %v1755_v0  ;;  %v1980_v11 = vld [vmem:[#allocation2 + $0x2e4] sm:$0xf]  ;;  %v1683_v13 = vld [vmem:[#allocation2 + $0x2e8] sm:$0xf0]  ;;  %v1622_v20 = vor.u32 %v1964_v7, %v1619_v10  ;;  %v1962_v23 = vld [vmem:[#allocation2 + $0x254] sm:$0xf] }
  0x4e   :  { %951 = vmatpush.bf16.msra.mxu0 %v1366_v41  ;;  %v1922_v41 = vld [vmem:[#allocation2 + $0x114] sm:$0xf]  ;;  %v1811_v19 = vld [vmem:[#allocation2 + $0x3e8] sm:$0xf0]  ;;  %v1686_v21 = vor.u32 %v1980_v11, %v1683_v13  ;;  %v1611_v24 = vld [vmem:[#allocation2 + $0x258] sm:$0xf0] }
  0x4f   :  { %964 = vmatpush.bf16.msra.mxu1 %v1430_v43  ;;  %v1451_v43 = vld [vmem:[#allocation2 + $0x118] sm:$0xf0]  ;;  %v1978_v27 = vld [vmem:[#allocation2 + $0x2d4] sm:$0xf]  ;;  %v1614_v35 = vor.u32 %v1962_v23, %v1611_v24  ;;  %v1960_v40 = vld [vmem:[#allocation2 + $0x244] sm:$0xf] }
  0x50   :  { %977 = vmatpush.bf16.msra.mxu2 %v1494_v44  ;;  %v1938_v44 = vld [vmem:[#allocation2 + $0x194] sm:$0xf]  ;;  %v1454_v50 = vor.u32 %v1922_v41, %v1451_v43  ;;  %v1675_v29 = vld [vmem:[#allocation2 + $0x2d8] sm:$0xf0]  ;;  %v1603_v41 = vld [vmem:[#allocation2 + $0x248] sm:$0xf0] }
  0x51   :  { %990 = vmatpush.bf16.msra.mxu3 %v1558_v48  ;;  %v1315_v48 = vld [vmem:[#allocation2 + $0x8] sm:$0xf0]  ;;  %v1803_v34 = vld [vmem:[#allocation2 + $0x3d8] sm:$0xf0]  ;;  %v1678_v36 = vor.u32 %v1978_v27, %v1675_v29  ;;  %v1974_v51 = vld [vmem:[#allocation2 + $0x2b4] sm:$0xf] }
  0x52   :  { %952 = vmatpush.bf16.msra.mxu0 %v1358_v54  ;;  %v1518_v54 = vor.u32 %v1938_v44, %v1515_v45  ;;  %v1318_v61 = vor.u32 %v1888_v47, %v1315_v48  ;;  %v1667_v44 = vld [vmem:[#allocation2 + $0x2c8] sm:$0xf0]  ;;  %v1992_v45 = vld [vmem:[#allocation2 + $0x344] sm:$0xf]  ;;  %v1579_v10 = vld [vmem:[#allocation2 + $0x218] sm:$0xf0] }
  0x53   :  { %965 = vmatpush.bf16.msra.mxu1 %v1422_v55  ;;  %v1443_v55 = vld [vmem:[#allocation2 + $0x108] sm:$0xf0]  ;;  %v2008_v47 = vld [vmem:[#allocation2 + $0x3c4] sm:$0xf]  ;;  %v1970_v11 = vld [vmem:[#allocation2 + $0x294] sm:$0xf] }
  0x54   :  { %978 = vmatpush.bf16.msra.mxu2 %v1486_v56  ;;  %v1936_v56 = vld [vmem:[#allocation2 + $0x184] sm:$0xf]  ;;  %v1643_v13 = vld [vmem:[#allocation2 + $0x298] sm:$0xf0]  ;;  %v1571_v24 = vld [vmem:[#allocation2 + $0x208] sm:$0xf0] }
  0x55   :  { %991 = vmatpush.bf16.msra.mxu3 %v1550_v60  ;;  %v1982_v60 = vld [vmem:[#allocation2 + $0x2f4] sm:$0xf]  ;;  %v1510_v5 = vor.u32 %v1936_v56, %v1507_v57  ;;  %v1787_v57 = vld [vmem:[#allocation2 + $0x3b8] sm:$0xf0]  ;;  %v1972_v63 = vld [vmem:[#allocation2 + $0x2a4] sm:$0xf] }
  0x56   :  { %953 = vmatpush.bf16.msra.mxu0 %v1350_v2  ;;  %v1446_v2 = vor.u32 %v1920_v53, %v1443_v55  ;;  %v1659_v53 = vld [vmem:[#allocation2 + $0x2b8] sm:$0xf0]  ;;  %v2006_v56 = vld [vmem:[#allocation2 + $0x3b4] sm:$0xf]  ;;  %v1952_v23 = vld [vmem:[#allocation2 + $0x204] sm:$0xf] }
  0x57   :  { %966 = vmatpush.bf16.msra.mxu1 %v1414_v3  ;;  %v2014_v3 = vld [vmem:[#allocation2 + $0x3f4] sm:$0xf]  ;;  %v1723_v55 = vld [vmem:[#allocation2 + $0x338] sm:$0xf0]  ;;  %v1662_v59 = vor.u32 %v1974_v51, %v1659_v53  ;;  %v1790_v0 = vor.u32 %v2006_v56, %v1787_v57  ;;  %v1968_v27 = vld [vmem:[#allocation2 + $0x284] sm:$0xf] }
  0x58   :  { %979 = vmatpush.bf16.msra.mxu2 %v1478_v4  ;;  %v1819_v4 = vld [vmem:[#allocation2 + $0x3f8] sm:$0xf0]  ;;  %v1635_v29 = vld [vmem:[#allocation2 + $0x288] sm:$0xf0]  ;;  %s2152_s21 = smov [#allocation5]   ;;  %s2153_s23 = smov [#allocation6]  }
  0x59   :  { %992 = vmatpush.bf16.msra.mxu3 %v1542_v8  ;;  %v1694_v8 = vor.u32 %v1982_v60, %v1691_v62  ;;  %v1822_v12 = vor.u32 %v2014_v3, %v1819_v4  ;;  %v1587_v62 = vld [vmem:[#allocation2 + $0x228] sm:$0xf0]  ;;  %v2004_v4 = vld [vmem:[#allocation2 + $0x3a4] sm:$0xf]  ;;  %s1268_s22 = sshll.u32 %s2152_s21, 4  ;;  %s1279_s5 = sshll.u32 %s2153_s23, 4  ;;  %s1269_s22 = int_to_ptr.vmem [resolvable:$true] %s1268_s22  ;;  %s1280_s5 = int_to_ptr.vmem [resolvable:$true] %s1279_s5 }
  0x5a   :  { %954 = vmatpush.bf16.msra.mxu0 %v1342_v14  ;;  %v1996_v14 = vld [vmem:[#allocation2 + $0x364] sm:$0xf]  ;;  %v1715_v3 = vld [vmem:[#allocation2 + $0x328] sm:$0xf0]  ;;  %s1281_s26 = sshll.u32 %s2310_s6, 4  ;;  %s2154_s27 = smov [#allocation8]   ;;  %s1282_s26 = int_to_ptr.hbm [resolvable:$true] %s1281_s26 }
  0x5b   :  { %967 = vmatpush.bf16.msra.mxu1 %v1406_v15  ;;  %v1747_v15 = vld [vmem:[#allocation2 + $0x368] sm:$0xf0]  ;;  %s1292_s30 = sshll.u32 %s2311_s7, 4  ;;  %s1293_s30 = int_to_ptr.hbm [resolvable:$true] %s1292_s30 }
  0x5c   :  { %980 = vmatpush.bf16.msra.mxu2 %v1470_v16  ;;  %v2012_v16 = vld [vmem:[#allocation2 + $0x3e4] sm:$0xf] }
  0x5d   :  { %993 = vmatpush.bf16.msra.mxu3 %v1534_v22  ;;  %v1750_v22 = vor.u32 %v1996_v14, %v1747_v15  ;;  %v1814_v28 = vor.u32 %v2012_v16, %v1811_v19  ;;  %v1986_v14 = vld [vmem:[#allocation2 + $0x314] sm:$0xf]  ;;  %v1707_v15 = vld [vmem:[#allocation2 + $0x318] sm:$0xf0] }
  0x5e   :  { %955 = vmatpush.bf16.msra.mxu0 %v1334_v30  ;;  %v1994_v30 = vld [vmem:[#allocation2 + $0x354] sm:$0xf]  ;;  %v1771_v19 = vld [vmem:[#allocation2 + $0x398] sm:$0xf0] }
  0x5f   :  { %968 = vmatpush.bf16.msra.mxu1 %v1398_v31  ;;  %v1739_v31 = vld [vmem:[#allocation2 + $0x358] sm:$0xf0]  ;;  %v2002_v16 = vld [vmem:[#allocation2 + $0x394] sm:$0xf] }
  0x60   :  { %981 = vmatpush.bf16.msra.mxu2 %v1462_v32  ;;  %v2010_v32 = vld [vmem:[#allocation2 + $0x3d4] sm:$0xf] }
  0x61   :  { %994 = vmatpush.bf16.msra.mxu3 %v1526_v39  ;;  %v1742_v39 = vor.u32 %v1994_v30, %v1739_v31  ;;  %v1806_v43 = vor.u32 %v2010_v32, %v1803_v34  ;;  %v1984_v30 = vld [vmem:[#allocation2 + $0x304] sm:$0xf]  ;;  %v1699_v31 = vld [vmem:[#allocation2 + $0x308] sm:$0xf0] }
  0x62   :  { %956 = vmatpush.bf16.msra.mxu0 %v1326_v46  ;;  %v1731_v46 = vld [vmem:[#allocation2 + $0x348] sm:$0xf0]  ;;  %v2000_v32 = vld [vmem:[#allocation2 + $0x384] sm:$0xf] }
  0x63   :  { %969 = vmatpush.bf16.msra.mxu1 %v1390_v49  ;;  %v1958_v49 = vld [vmem:[#allocation2 + $0x234] sm:$0xf]  ;;  %v1763_v34 = vld [vmem:[#allocation2 + $0x388] sm:$0xf0] }
  0x64   :  { %982 = vmatpush.bf16.msra.mxu2 %v1454_v50  ;;  %v1595_v50 = vld [vmem:[#allocation2 + $0x238] sm:$0xf0] }
  0x65   :  { %995 = vmatpush.bf16.msra.mxu3 %v1518_v54  ;;  %v1990_v54 = vld [vmem:[#allocation2 + $0x334] sm:$0xf]  ;;  %v1598_v58 = vor.u32 %v1958_v49, %v1595_v50 }
  0x66   :  { %957 = vmatpush.bf16.msra.mxu0 %v1318_v61  ;;  %v1726_v60 = vor.u32 %v1990_v54, %v1723_v55  ;;  %v1956_v61 = vld [vmem:[#allocation2 + $0x224] sm:$0xf] }
  0x67   :  { %970 = vmatpush.bf16.msra.mxu1 %v1382_v1  ;;  %v1651_v1 = vld [vmem:[#allocation2 + $0x2a8] sm:$0xf0] }
  0x68   :  { %983 = vmatpush.bf16.msra.mxu2 %v1446_v2  ;;  %v1988_v2 = vld [vmem:[#allocation2 + $0x324] sm:$0xf]  ;;  %v1654_v7 = vor.u32 %v1972_v63, %v1651_v1  ;;  %v2031_v63 = vld [vmem:[%s2307_s3 + $0x78] sm:$0xff] }
  0x69   :  { %996 = vmatpush.bf16.msra.mxu3 %v1510_v5  ;;  %958 = vmatmul.bf16.vlgmr.msra.gmra.mxu0 %v2203_v18  ;;  %v1795_v18 = vld [vmem:[#allocation2 + $0x3c8] sm:$0xf0] }
  0x6a   :  { %1002 = vmatpush.bf16.msrb.mxu0 %v1630_v6  ;;  %971 = vmatmul.bf16.vlgmr.msra.gmra.mxu1 %v2207_v26  ;;  %v1734_v26 = vor.u32 %v1992_v45, %v1731_v46  ;;  %v1798_v52 = vor.u32 %v2008_v47, %v1795_v18  ;;  %v1779_v5 = vld [vmem:[#allocation2 + $0x3a8] sm:$0xf0]  ;;  %v1590_v6 = vor.u32 %v1956_v61, %v1587_v62  ;;  %v2016_v47 = vld [vmem:[%s2307_s3] sm:$0xff] }
  0x6b   :  { %1015 = vmatpush.bf16.msrb.mxu1 %v1694_v8  ;;  %984 = vmatmul.bf16.vlgmr.msra.gmra.mxu2 %v2201_v17  ;;  %v1976_v17 = vld [vmem:[#allocation2 + $0x2c4] sm:$0xf]  ;;  %v1718_v8 = vor.u32 %v1988_v2, %v1715_v3  ;;  %v2030_v2 = vld [vmem:[%s2307_s3 + $0x70] sm:$0xff] }
  0x6c   :  { %1028 = vmatpush.bf16.msrb.mxu2 %v1758_v9  ;;  %997 = vmatmul.bf16.vlgmr.msra.gmra.mxu3 %v2205_v25  ;;  %v1606_v25 = vor.u32 %v1960_v40, %v1603_v41  ;;  %v1670_v48 = vor.u32 %v1976_v17, %v1667_v44  ;;  %v1954_v9 = vld [vmem:[#allocation2 + $0x214] sm:$0xf]  ;;  %v1766_v40 = vor.u32 %v2000_v32, %v1763_v34  ;;  %v2022_v17 = vld [vmem:[%s2307_s3 + $0x30] sm:$0xff]  ;;  %v200_v44 = vld [vmem:[%s2306_s2] sm:$0x3]  ;;  %s1290_s2 = sshll.u32 %s2154_s27, 4  ;;  %s1291_s2 = int_to_ptr.vmem [resolvable:$true] %s1290_s2 }
  0x6d   :  { %1041 = vmatpush.bf16.msrb.mxu3 %v1822_v12  ;;  %v1782_v12 = vor.u32 %v2004_v4, %v1779_v5  ;;  %v2023_v41 = vld [vmem:[%s2307_s3 + $0x38] sm:$0xff]  ;;  %v202_v18 = vperm.slane %v200_v44, 0 }
  0x6e   :  { %1003 = vmatpush.bf16.msrb.mxu0 %v1622_v20  ;;  %v1582_v20 = vor.u32 %v1954_v9, %v1579_v10  ;;  %v2028_v9 = vld [vmem:[%s2307_s3 + $0x60] sm:$0xff]  ;;  %v2027_v10 = vld [vmem:[%s2307_s3 + $0x58] sm:$0xff] }
  0x6f   :  { %1016 = vmatpush.bf16.msrb.mxu1 %v1686_v21  ;;  %v1646_v21 = vor.u32 %v1970_v11, %v1643_v13  ;;  %v2026_v11 = vld [vmem:[%s2307_s3 + $0x50] sm:$0xff] }
  0x70   :  { %1029 = vmatpush.bf16.msrb.mxu2 %v1750_v22  ;;  %v1710_v22 = vor.u32 %v1986_v14, %v1707_v15  ;;  %v2025_v14 = vld [vmem:[%s2307_s3 + $0x48] sm:$0xff] }
  0x71   :  { %1042 = vmatpush.bf16.msrb.mxu3 %v1814_v28  ;;  %v1774_v28 = vor.u32 %v2002_v16, %v1771_v19 }
  0x72   :  { %1004 = vmatpush.bf16.msrb.mxu0 %v1614_v35  ;;  %v1574_v35 = vor.u32 %v1952_v23, %v1571_v24 }
  0x73   :  { %1017 = vmatpush.bf16.msrb.mxu1 %v1678_v36  ;;  %v1638_v36 = vor.u32 %v1968_v27, %v1635_v29 }
  0x74   :  { %1030 = vmatpush.bf16.msrb.mxu2 %v1742_v39  ;;  %v1702_v39 = vor.u32 %v1984_v30, %v1699_v31 }
  0x75   :  { %1043 = vmatpush.bf16.msrb.mxu3 %v1806_v43  ;;  %v2021_v43 = vld [vmem:[%s2307_s3 + $0x28] sm:$0xff] }
  0x76   :  { %1005 = vmatpush.bf16.msrb.mxu0 %v1606_v25 }
  0x77   :  { %1018 = vmatpush.bf16.msrb.mxu1 %v1670_v48 }
  0x78   :  { %1031 = vmatpush.bf16.msrb.mxu2 %v1734_v26 }
  0x79   :  { %1044 = vmatpush.bf16.msrb.mxu3 %v1798_v52 }
  0x7a   :  { %1006 = vmatpush.bf16.msrb.mxu0 %v1598_v58 }
  0x7b   :  { %1019 = vmatpush.bf16.msrb.mxu1 %v1662_v59 }
  0x7c   :  { %1032 = vmatpush.bf16.msrb.mxu2 %v1726_v60 }
  0x7d   :  { %1045 = vmatpush.bf16.msrb.mxu3 %v1790_v0 }
  0x7e   :  { %1007 = vmatpush.bf16.msrb.mxu0 %v1590_v6  ;;  %v2029_v6 = vld [vmem:[%s2307_s3 + $0x68] sm:$0xff] }
  0x7f   :  { %1020 = vmatpush.bf16.msrb.mxu1 %v1654_v7 }
  0x80   :  { %1033 = vmatpush.bf16.msrb.mxu2 %v1718_v8 }
  0x81   :  { %1046 = vmatpush.bf16.msrb.mxu3 %v1782_v12 }
  0x82   :  { %1008 = vmatpush.bf16.msrb.mxu0 %v1582_v20  ;;  %v2024_v20 = vld [vmem:[%s2307_s3 + $0x40] sm:$0xff] }
  0x83   :  { %1021 = vmatpush.bf16.msrb.mxu1 %v1646_v21 }
  0x84   :  { %1034 = vmatpush.bf16.msrb.mxu2 %v1710_v22  ;;  %v203_v22 = vperm.slane %v200_v44, 1 }
  0x85   :  { %1047 = vmatpush.bf16.msrb.mxu3 %v1774_v28 }
  0x86   :  { %1009 = vmatpush.bf16.msrb.mxu0 %v1574_v35 }
  0x87   :  { %1022 = vmatpush.bf16.msrb.mxu1 %v1638_v36 }
  0x88   :  { %1035 = vmatpush.bf16.msrb.mxu2 %v1702_v39 }
  0x89   :  { %1048 = vmatpush.bf16.msrb.mxu3 %v1766_v40  ;;  %1010 = vmatmul.bf16.vlgmr.msrb.gmra.mxu0 %v2218_v37  ;;  %v2020_v37 = vld [vmem:[%s2307_s3 + $0x20] sm:$0xff] }
  0x8a   :  { %1190 = vmatpush.bf16.msra.mxu0 %v2023_v41  ;;  %1023 = vmatmul.bf16.vlgmr.msrb.gmra.mxu1 %v2222_v42  ;;  %v2017_v42 = vld [vmem:[%s2307_s3 + $0x8] sm:$0xff] }
  0x8b   :  { %1036 = vmatmul.bf16.vlgmr.msrb.gmra.mxu2 %v2216_v33  ;;  %v2019_v33 = vld [vmem:[%s2307_s3 + $0x18] sm:$0xff]  ;;  %1203 = vmatpush.bf16.msra.mxu1 %v2031_v63 }
  0x8c   :  { %1049 = vmatmul.bf16.vlgmr.msrb.gmra.mxu3 %v2220_v38  ;;  %v2018_v38 = vld [vmem:[%s2307_s3 + $0x10] sm:$0xff] }
  0x8e   :  { %1191 = vmatpush.bf16.msra.mxu0 %v2022_v17 }
  0x8f   :  { %1204 = vmatpush.bf16.msra.mxu1 %v2030_v2 }
  0x92   :  { %1192 = vmatpush.bf16.msra.mxu0 %v2021_v43 }
  0x93   :  { %1205 = vmatpush.bf16.msra.mxu1 %v2029_v6 }
  0x96   :  { %1193 = vmatpush.bf16.msra.mxu0 %v2020_v37 }
  0x97   :  { %1206 = vmatpush.bf16.msra.mxu1 %v2028_v9 }
  0x9a   :  { %1194 = vmatpush.bf16.msra.mxu0 %v2019_v33 }
  0x9b   :  { %1207 = vmatpush.bf16.msra.mxu1 %v2027_v10 }
  0x9e   :  { %1195 = vmatpush.bf16.msra.mxu0 %v2018_v38 }
  0x9f   :  { %1208 = vmatpush.bf16.msra.mxu1 %v2026_v11 }
  0xa2   :  { %1196 = vmatpush.bf16.msra.mxu0 %v2017_v42 }
  0xa3   :  { %1209 = vmatpush.bf16.msra.mxu1 %v2025_v14 }
  0xa6   :  { %1197 = vmatpush.bf16.msra.mxu0 %v2016_v47 }
  0xa7   :  { %1210 = vmatpush.bf16.msra.mxu1 %v2024_v20 }
  0xa8   :  { %v855_v45 = vpop.f32.mrf.mxu0 }
  0xa9   :  { %v856_v26 = vadd.f32 %v855_v45, %v202_v18 }
  0xab   :  { %v868_v46 = vpop.f32.mrf.mxu1 }
  0xac   :  { %v869_v51 = vadd.f32 %v868_v46, %v856_v26  ;;  %v2038_v46 = vld [vmem:[%s2308_s4] ss:$0 sm:$0xff] }
  0xaf   :  { %v894_v48 = vpop.f32.mrf.mxu3 }
  0xb0   :  { %v881_v25 = vpop.f32.mrf.mxu2  ;;  %v857_v49 = vpop.f32.mrf.mxu0 }
  0xb1   :  { %v882_v54 = vadd.f32 %v881_v25, %v869_v51 }
  0xb3   :  { %v870_v50 = vpop.f32.mrf.mxu1  ;;  %v895_v55 = vadd.f32 %v894_v48, %v882_v54 }
  0xb7   :  { %v896_v53 = vpop.f32.mrf.mxu3 }
  0xb8   :  { %v883_v52 = vpop.f32.mrf.mxu2 }
  0xc6   :  { %v907_v56 = vpop.f32.mrf.mxu0 }
  0xc7   :  { %v908_v57 = vadd.f32 %v907_v56, %v895_v55  ;;  %v920_v58 = vpop.f32.mrf.mxu1 }
  0xc9   :  { %v921_v59 = vadd.f32 %v920_v58, %v908_v57 }
  0xce   :  { %v933_v60 = vpop.f32.mrf.mxu2  ;;  %v909_v1 = vpop.f32.mrf.mxu0 }
  0xcf   :  { %v934_v61 = vadd.f32 %v933_v60, %v921_v59  ;;  %v946_v62 = vpop.f32.mrf.mxu3  ;;  %v922_v3 = vpop.f32.mrf.mxu1 }
  0xd1   :  { %v947_v0 = vadd.f32 %v946_v62, %v934_v61 }
  0xd3   :  { %v1054_v4 = vmax.f32 %v947_v0, 0.0 }
  0xd5   :  { %v1056_v5 = vpack.c.bf16 %v1054_v4, %v1054_v4 }
  0xd6   :  { %v935_v7 = vpop.f32.mrf.mxu2 }
  0xd7   :  { %1198 = vmatmul.bf16.vlgmr.msra.gmra.mxu0 %v1056_v5  ;;  %v948_v8 = vpop.f32.mrf.mxu3 }
  0xe6   :  { %v959_v12 = vpop.f32.mrf.mxu0 }
  0xe7   :  { %v972_v13 = vpop.f32.mrf.mxu1  ;;  %v960_v27 = vadd.f32 %v959_v12, %v203_v22 }
  0xe9   :  { %v973_v28 = vadd.f32 %v972_v13, %v960_v27 }
  0xee   :  { %v985_v15 = vpop.f32.mrf.mxu2  ;;  %v961_v19 = vpop.f32.mrf.mxu0 }
  0xef   :  { %v998_v16 = vpop.f32.mrf.mxu3  ;;  %v974_v21 = vpop.f32.mrf.mxu1  ;;  %v986_v29 = vadd.f32 %v985_v15, %v973_v28 }
  0xf1   :  { %v999_v30 = vadd.f32 %v998_v16, %v986_v29 }
  0xf6   :  { %v987_v23 = vpop.f32.mrf.mxu2 }
  0xf7   :  { %v1000_v24 = vpop.f32.mrf.mxu3 }
 0x106   :  { %v1011_v31 = vpop.f32.mrf.mxu0 }
 0x107   :  { %v1024_v32 = vpop.f32.mrf.mxu1  ;;  %v1012_v34 = vadd.f32 %v1011_v31, %v999_v30 }
 0x109   :  { %v1025_v35 = vadd.f32 %v1024_v32, %v1012_v34 }
 0x10e   :  { %v1037_v36 = vpop.f32.mrf.mxu2  ;;  %v1013_v41 = vpop.f32.mrf.mxu0 }
 0x10f   :  { %v1038_v39 = vadd.f32 %v1037_v36, %v1025_v35  ;;  %v1050_v40 = vpop.f32.mrf.mxu3  ;;  %v1026_v17 = vpop.f32.mrf.mxu1 }
 0x111   :  { %v1051_v43 = vadd.f32 %v1050_v40, %v1038_v39 }
 0x113   :  { %v1055_v37 = vmax.f32 %v1051_v43, 0.0 }
 0x115   :  { %v1057_v33 = vpack.c.bf16 %v1055_v37, %v1055_v37 }
 0x116   :  { %v1039_v38 = vpop.f32.mrf.mxu2 }
 0x117   :  { %v1052_v42 = vpop.f32.mrf.mxu3  ;;  %1211 = vmatmul.bf16.vlgmr.msra.gmra.mxu1 %v1057_v33 }
 0x154   :  { %v1199_v44 = vpop.f32.mrf.mxu0 }
 0x155   :  { %v1200_v47 = vadd.f32 %v2038_v46, %v1199_v44 }
 0x15c   :  { %v1201_v45 = vpop.f32.mrf.mxu0 }
 0x194   :  { %v1212_v18 = vpop.f32.mrf.mxu1 }
 0x195   :  { %v1213_v25 = vadd.f32 %v1212_v18, %v1200_v47 }
 0x197   :  { %v1887_v48 = vmul.f32 -1.442695, %v1213_v25  ;;  %1262 = vst.msk [vmem:[#allocation8] sm:$0x3] %vm1235_vm0, %v1213_v25 }
 0x199   :  { %2039 = vpow2.f32 %v1887_v48 }
 0x19c   :  { %v1214_v26 = vpop.f32.mrf.mxu1 }
 0x19f   :  { %v2040_v49 = vpop.eup %2039 }
 0x1a0   :  { %v1219_v50 = vadd.f32 1.0, %v2040_v49 }
 0x1a2   :  { %2041 = vrcp.f32 %v1219_v50  ;;  %v1231_v54 = vand.u32 2147483648, %v1219_v50  ;;  %v1229_v56 = vand.u32 2147483647, %v1219_v50  ;;  %vm1225_vm2 = vweird.f32 %v1219_v50 }
 0x1a4   :  { %v1232_v58 = vor.u32 1.1754944e-38, %v1231_v54  ;;  %vm1230_vm4 = vcmp.eq.f32.partialorder %v1229_v56, 8.507059e+37 }
 0x1a8   :  { %v2042_v51 = vpop.eup %2041 }
 0x1a9   :  { %v1221_v52 = vmul.f32 %v2042_v51, %v1219_v50  ;;  %vm1226_vm1 = vweird.f32 %v2042_v51 }
 0x1aa   :  { %vm1227_vm3 = vmor %vm1225_vm2, %vm1226_vm1 }
 0x1ab   :  { %v1222_v53 = vsub.f32 1.0, %v1221_v52 }
 0x1ad   :  { %v1223_v55 = vmul.f32 %v2042_v51, %v1222_v53 }
 0x1af   :  { %v1224_v57 = vadd.f32 %v2042_v51, %v1223_v55 }
 0x1b1   :  { %v1228_v59 = vsel %vm1227_vm3, %v2042_v51, %v1224_v57 }
 0x1b2   :  { %v1233_v60 = vsel %vm1230_vm4, %v1232_v58, %v1228_v59 }
 0x1b3   :  { %v1236_v61 = vsel %vm1235_vm0, %v1233_v60, -inf  ;;  %1260 = vst.msk [vmem:[#allocation5] sm:$0x3] %vm1235_vm0, %v1233_v60 }
 0x1b4   :  { %1237 = vmax.xlane.f32.xlu0 %v1236_v61  ;;  %1273 = dma.vmem_to_hbm [thread:$0]  %s1269_s22, 32, %s1271_s20, [#allocation4]  }
 0x227   :  { %v1238_v62 = vpop.xlane.xlu0 %1237 }
 0x228   :  { %v1239_v63 = vsub.f32 %v1233_v60, %v1238_v62 }
 0x22a   :  { %v1240_v0 = vmul.f32 1.442695, %v1239_v63 }
 0x22c   :  { %2043 = vpow2.f32 %v1240_v0 }
 0x232   :  { %v2044_v1 = vpop.eup %2043 }
 0x233   :  { %v1242_v2 = vsel %vm1235_vm0, %v2044_v1, 0.0 }
 0x234   :  { %1243 = vadd.xlane.f32.xlu0 %v1242_v2 }
 0x2a7   :  { %v1244_v3 = vpop.xlane.xlu0 %1243 }
 0x2a8   :  { %2045 = vrcp.f32 %v1244_v3  ;;  %v1256_v7 = vand.u32 2147483648, %v1244_v3  ;;  %v1254_v9 = vand.u32 2147483647, %v1244_v3  ;;  %vm1250_vm6 = vweird.f32 %v1244_v3 }
 0x2aa   :  { %v1257_v11 = vor.u32 1.1754944e-38, %v1256_v7  ;;  %vm1255_vm8 = vcmp.eq.f32.partialorder %v1254_v9, 8.507059e+37 }
 0x2ae   :  { %v2046_v4 = vpop.eup %2045 }
 0x2af   :  { %v1246_v5 = vmul.f32 %v2046_v4, %v1244_v3  ;;  %vm1251_vm5 = vweird.f32 %v2046_v4 }
 0x2b0   :  { %vm1252_vm7 = vmor %vm1250_vm6, %vm1251_vm5 }
 0x2b1   :  { %v1247_v6 = vsub.f32 1.0, %v1246_v5 }
 0x2b3   :  { %v1248_v8 = vmul.f32 %v2046_v4, %v1247_v6 }
 0x2b5   :  { %v1249_v10 = vadd.f32 %v2046_v4, %v1248_v8 }
 0x2b7   :  { %v1253_v12 = vsel %vm1252_vm7, %v2046_v4, %v1249_v10 }
 0x2b8   :  { %v1258_v13 = vsel %vm1255_vm8, %v1257_v11, %v1253_v12 }
 0x2b9   :  { %v1259_v14 = vmul.f32 %v2044_v1, %v1258_v13 }
 0x2bb   :  { %1261 = vst.msk [vmem:[#allocation6] sm:$0x3] %vm1235_vm0, %v1259_v14 }
 0x2bc   :  { %1284 = dma.vmem_to_hbm [thread:$0]  %s1280_s5, 32, %s1282_s26, [#allocation7]  }
 0x2bd   :  { %1295 = dma.vmem_to_hbm [thread:$0]  %s1291_s2, 32, %s1293_s30, [#allocation7]  }
 0x2be   :  { %2145 = dma.done.wait [#allocation4], 32  }
 0x2bf   :  { %2146 = vsyncadd [#allocation4], 4294967264 }
 0x2c0   :  { %2147 = dma.done.wait [#allocation7], 64  }
 0x2c1   :  { %2148 = vsyncadd [#allocation7], 4294967232 }
 0x2c2   :  { %1308 = vsyncpa [#allocation3], 1 }
 0x2c3   :  { %1309 = vsyncpa [#allocation4], 1 }
 0x2c4   :  { %1310 = vsyncpa [#allocation7], 1 }

</bundles_post_ra>
